<compile_context>
chip_gen: v5e
topology: v5e:2x2
jax: 0.10.0
libtpu: 0.0.40
codegen_flags: <defaults>
</compile_context>

<pallas_src>
import jax
import jax.numpy as jnp
from jax.experimental import pallas as pl
from jax.experimental.pallas import tpu as pltpu


def _focus_conv_kernel(w_ref, b_ref, x_ref, o_ref):
    # w_ref: (Cout, K)      BN-scale-folded 1x1 conv weight
    # b_ref: (Cout, 1)      folded BatchNorm bias (f32)
    # x_ref: (K, tile_p)    input-channels x pixels (pixels on the lane axis)
    # o_ref: (Cout, tile_p)
    acc = jnp.dot(w_ref[...], x_ref[...], preferred_element_type=jnp.float32)
    y = acc + b_ref[...]                      # f32 math regardless of input dtype
    o_ref[...] = (y * jax.nn.sigmoid(y)).astype(o_ref.dtype)   # SiLU, narrow on store


def _pick_pixel_tile(P, max_tile=4096):
    """Largest lane-dense (multiple-of-128) tile dividing P, else the full extent."""
    if P <= max_tile:
        return P
    t = (max_tile // 128) * 128
    while t >= 128:
        if P % t == 0:
            return t
        t -= 128
    return P  # fallback: single tile along the pixel axis (always legal)


def focus_forward(x, conv_w, bn_gamma, bn_beta, bn_mean, bn_var,
                  eps=1e-5, max_pixel_tile=4096,
                  compute_dtype=None, out_dtype=None):
    """YOLOX Focus forward.  x: (B, Cin, H, W) NCHW.  Returns (B, Cout, H/2, W/2)."""
    B, Cin, H, W = x.shape
    Cout = conv_w.shape[0]
    H2, W2 = H // 2, W // 2
    K = 4 * Cin
    P = H2 * W2
    compute_dtype = compute_dtype or x.dtype
    out_dtype = out_dtype or x.dtype

    # --- space-to-depth, matches torch.cat order: TL, BL, TR, BR.
    # Single fused XLA slice+concat; stays in NCHW so no transposes are needed.
    # TODO(synk): fuse this gather into the kernel (strided in-kernel DMA of the
    # four quadrants) to remove the remaining |x|-sized HBM round trip.
    tl = x[:, :, ::2, ::2]
    bl = x[:, :, 1::2, ::2]
    tr = x[:, :, ::2, 1::2]
    br = x[:, :, 1::2, 1::2]
    xs = jnp.concatenate([tl, bl, tr, br], axis=1)            # (B, K, H2, W2)
    xs = xs.reshape(B, K, P).astype(compute_dtype)            # free reshape

    # --- fold eval-mode BatchNorm: scale into the weight rows, bias kept separate.
    scale = bn_gamma / jnp.sqrt(bn_var + eps)                 # (Cout,)
    bias = bn_beta - bn_mean * scale                          # (Cout,)
    w = (conv_w.reshape(Cout, K) * scale[:, None]).astype(compute_dtype)
    b2 = bias.reshape(Cout, 1).astype(jnp.float32)

    tile_p = _pick_pixel_tile(P, max_pixel_tile)
    n_tiles = P // tile_p

    out = pl.pallas_call(
        _focus_conv_kernel,
        out_shape=jax.ShapeDtypeStruct((B, Cout, P), out_dtype),
        grid_spec=pltpu.PrefetchScalarGridSpec(
            num_scalar_prefetch=0,
            grid=(B, n_tiles),
            in_specs=[
                pl.BlockSpec((Cout, K), lambda b, j: (0, 0)),          # weight (resident)
                pl.BlockSpec((Cout, 1), lambda b, j: (0, 0)),          # bias   (resident)
                pl.BlockSpec((None, K, tile_p), lambda b, j: (b, 0, j)),  # activations
            ],
            out_specs=pl.BlockSpec((None, Cout, tile_p), lambda b, j: (b, 0, j)),
        ),
        compiler_params=pltpu.CompilerParams(
            dimension_semantics=("parallel", "parallel")),
    )(w, b2, xs)

    return out.reshape(B, Cout, H2, W2)                        # NCHW, free reshape


def _reference(x, conv_w, bn_gamma, bn_beta, bn_mean, bn_var, eps=1e-5):
    tl = x[:, :, ::2, ::2]
    bl = x[:, :, 1::2, ::2]
    tr = x[:, :, ::2, 1::2]
    br = x[:, :, 1::2, 1::2]
    xs = jnp.concatenate([tl, bl, tr, br], axis=1)
    z = jnp.einsum('bchw,oc->bohw', xs, conv_w.reshape(conv_w.shape[0], -1))
    scale = bn_gamma / jnp.sqrt(bn_var + eps)
    bias = bn_beta - bn_mean * scale
    y = z * scale[None, :, None, None] + bias[None, :, None, None]
    return y * jax.nn.sigmoid(y)


if __name__ == "__main__":
    key = jax.random.PRNGKey(0)
    k_x, k_w, k_g, k_b, k_m, k_v = jax.random.split(key, 6)

    B, Cin, H, W = 2, 4, 16, 16
    Cout, ksize = 32, 1   # Focus default ksize=1, stride=1

    x = jax.random.normal(k_x, (B, Cin, H, W), dtype=jnp.float32)
    conv_w = jax.random.normal(k_w, (Cout, 4 * Cin, ksize, ksize), dtype=jnp.float32) * 0.1
    bn_gamma = 1.0 + 0.1 * jax.random.normal(k_g, (Cout,), dtype=jnp.float32)
    bn_beta = 0.1 * jax.random.normal(k_b, (Cout,), dtype=jnp.float32)
    bn_mean = 0.1 * jax.random.normal(k_m, (Cout,), dtype=jnp.float32)
    bn_var = jnp.abs(jax.random.normal(k_v, (Cout,), dtype=jnp.float32)) + 0.5

    ref = _reference(x, conv_w, bn_gamma, bn_beta, bn_mean, bn_var)

    # f32 path: exact module semantics.
    out = focus_forward(x, conv_w, bn_gamma, bn_beta, bn_mean, bn_var)
    out = jax.block_until_ready(out)
    assert out.shape == (B, Cout, H // 2, W // 2), out.shape
    assert jnp.allclose(out, ref, atol=1e-4, rtol=1e-4), "f32 mismatch vs reference"

    # bf16-activation path: halves input-side HBM traffic; accumulation, BN bias
    # and SiLU stay in f32, output stored in f32.
    out_bf16 = focus_forward(x, conv_w, bn_gamma, bn_beta, bn_mean, bn_var,
                             compute_dtype=jnp.bfloat16, out_dtype=jnp.float32)
    out_bf16 = jax.block_until_ready(out_bf16)
    assert jnp.allclose(out_bf16, ref, atol=5e-2, rtol=5e-2), "bf16 mismatch vs reference"

    print("KERNEL_OK")
</pallas_src>

<mosaic_0001>
module attributes {stable_mosaic.version = 11 : i64} {
  func.func @_focus_conv_kernel(%arg0: i32, %arg1: i32, %arg2: memref<32x16xf32, #tpu.memory_space<vmem>>, %arg3: memref<32x1xf32, #tpu.memory_space<vmem>>, %arg4: memref<1x16x64xf32, #tpu.memory_space<vmem>>, %arg5: memref<1x32x64xf32, #tpu.memory_space<vmem>>) attributes {dimension_semantics = [#tpu.dimension_semantics<parallel>, #tpu.dimension_semantics<parallel>], iteration_bounds = array<i64: 2, 1>, scalar_prefetch = 0 : i64, scratch_operands = 0 : i64, tpu.core_type = #tpu.core_type<tc>, window_params = [{pipeline_mode = #tpu.pipeline_mode<synchronous>, transform_indices = @transform_0, window_bounds = array<i64: 32, 16>}, {pipeline_mode = #tpu.pipeline_mode<synchronous>, transform_indices = @transform_1, window_bounds = array<i64: 32, 1>}, {transform_indices = @transform_2, window_bounds = array<i64: 1, 16, 64>}, {transform_indices = @transform_3, window_bounds = array<i64: 1, 32, 64>}]} {
    %c0 = arith.constant 0 : index
    %c0_0 = arith.constant 0 : index
    %0 = vector.load %arg2[%c0, %c0_0] : memref<32x16xf32, #tpu.memory_space<vmem>>, vector<32x16xf32>
    %c0_1 = arith.constant 0 : index
    %c0_2 = arith.constant 0 : index
    %c0_3 = arith.constant 0 : index
    %1 = vector.load %arg4[%c0_1, %c0_2, %c0_3] : memref<1x16x64xf32, #tpu.memory_space<vmem>>, vector<1x16x64xf32>
    %2 = vector.shape_cast %1 : vector<1x16x64xf32> to vector<16x64xf32>
    %cst = arith.constant dense<0.000000e+00> : vector<32x64xf32>
    %3 = tpu.matmul %0, %2, %cst {dimension_numbers = #tpu.dot_dimension_numbers<[1], [0], [0], [1], [0, 0, 1, 1], [], []>} : vector<32x16xf32>, vector<16x64xf32>, vector<32x64xf32> -> vector<32x64xf32>
    %c0_4 = arith.constant 0 : index
    %c0_5 = arith.constant 0 : index
    %4 = vector.load %arg3[%c0_4, %c0_5] : memref<32x1xf32, #tpu.memory_space<vmem>>, vector<32x1xf32>
    %5 = vector.broadcast %4 : vector<32x1xf32> to vector<32x64xf32>
    %6 = arith.addf %3, %5 : vector<32x64xf32>
    %7 = arith.negf %6 : vector<32x64xf32>
    %8 = math.exp %7 : vector<32x64xf32>
    %cst_6 = arith.constant 1.000000e+00 : f32
    %9 = vector.broadcast %cst_6 : f32 to vector<32x64xf32>
    %10 = arith.addf %9, %8 : vector<32x64xf32>
    %11 = arith.divf %9, %10 : vector<32x64xf32>
    %12 = arith.mulf %6, %11 : vector<32x64xf32>
    %c0_7 = arith.constant 0 : index
    %c0_8 = arith.constant 0 : index
    %c0_9 = arith.constant 0 : index
    %13 = vector.load %arg5[%c0_7, %c0_8, %c0_9] : memref<1x32x64xf32, #tpu.memory_space<vmem>>, vector<1x32x64xf32>
    %14 = vector.shape_cast %13 : vector<1x32x64xf32> to vector<32x64xf32>
    %15 = vector.shape_cast %12 : vector<32x64xf32> to vector<1x32x64xf32>
    tpu.vector_store %arg5[%c0_7, %c0_8, %c0_9], %15 {strides = array<i32>} : memref<1x32x64xf32, #tpu.memory_space<vmem>>, vector<1x32x64xf32>,
    return
  }
  func.func @transform_0(%arg0: i32, %arg1: i32) -> (i32, i32) {
    %c0_i32 = arith.constant 0 : i32
    %c0_i32_0 = arith.constant 0 : i32
    %c0_i32_1 = arith.constant 0 : i32
    return %c0_i32, %c0_i32_0 : i32, i32
  }
  func.func @transform_1(%arg0: i32, %arg1: i32) -> (i32, i32) {
    %c0_i32 = arith.constant 0 : i32
    %c0_i32_0 = arith.constant 0 : i32
    %c0_i32_1 = arith.constant 0 : i32
    return %c0_i32, %c0_i32_0 : i32, i32
  }
  func.func @transform_2(%arg0: i32, %arg1: i32) -> (i32, i32, i32) {
    %c0_i32 = arith.constant 0 : i32
    %c0_i32_0 = arith.constant 0 : i32
    return %arg0, %c0_i32, %arg1 : i32, i32, i32
  }
  func.func @transform_3(%arg0: i32, %arg1: i32) -> (i32, i32, i32) {
    %c0_i32 = arith.constant 0 : i32
    %c0_i32_0 = arith.constant 0 : i32
    return %arg0, %c0_i32, %arg1 : i32, i32, i32
  }
}

</mosaic_0001>

<bundles_post_ra>
// kernel: tpu_custom_call.1
= control target key start
LH: loop header
LB: loop body
LE: loop exit
PB: predicated region body
PF: predicated region fallthrough
CT: control target
= control target key end

     0   :  { %8 = vsyncpa [#allocation3], 0  ;;  %s813_s0 = inlined_call_operand.vmem [shape: f32[32,16], index: 0, kind: input, shape index: {}]   ;;  %s814_s1 = inlined_call_operand.vmem [shape: f32[32,1], index: 1, kind: input, shape index: {}]   ;;  %s815_s2 = inlined_call_operand.vmem [shape: f32[2,16,64], index: 2, kind: input, shape index: {}]   ;;  %s816_s3 = inlined_call_operand.hbm [shape: f32[2,32,64], index: 3, kind: output, shape index: {}]  }
   0x1   :  { %10 = vsyncpa [#allocation3 + $0x1], 0  ;;  %s654_s12 = smov 0   ;;  %s656_s13 = smov 0  }
   0x2   :  { %s658_s14 = smov 0   ;;  %s660_s15 = smov 0  }
   0x3   :  { %s662_s16 = smov 0   ;;  %s664_s17 = smov 0  }
   0x4 LB: > { %s446_s18 = sadd.s32 4294967295, %s629_s17   ;;  %s447_s19 = sadd.s32 4294967294, %s629_s17   ;;  %s629_s17 = sphi %s664_s17, %s16_s17   ;;  %s625_s16 = sphi %s662_s16, %s823_s16   ;;  %s621_s15 = sphi %s660_s15, %s822_s15   ;;  %s617_s14 = sphi %s658_s14, %s821_s14   ;;  %s613_s13 = sphi %s656_s13, %s820_s13   ;;  %s609_s12 = sphi %s654_s12, %s819_s12  }
   0x5   : > { %s28_s20 = sadd.s32 1, %s625_s16  ;;  %s107_s21 = sadd.s32 1, %s617_s14 }
   0x6   : > { %p30_p0 = scmp.ge.s32.totalorder %s28_s20, 2  ;;  %p117_p1 = scmp.ne.s32.totalorder %s617_s14, %s613_s13 }
   0x7   : > { %p118_p2 = scmp.eq.s32.totalorder %s446_s18, 1  ;;  %p123_p3 = scmp.ne.s32.totalorder %s613_s13, %s609_s12 }
   0x8   : > { %s825_s20 = smov (%p30_p0, %s28_s20), 0  ;;  %p124_p5 = scmp.eq.s32.totalorder %s447_s19, 1 }
   0x9   : > { %p694_p4 = por %p118_p2, %p117_p1  ;;  %s102_s23 = ssub.s32 %s625_s16, %s825_s20 }
   0xa   : > { %p450_p6 = scmp.ge.s32.totalorder %s629_s17, 1  ;;  %p105_p7 = scmp.eq.s32.totalorder %s102_s23, 0 }
   0xb   : > { %p701_p8 = por %p124_p5, %p123_p3  ;;  %p159_p9 = scmp.lt.s32.totalorder %s629_s17, 3 }
   0xc   : > { %s707_s25 = scalar_select %p105_p7, %s617_s14, %s107_s21  }
   0xd   : > { %p160_p10 = pnand %p450_p6, %p159_p9 }
   0xe   : > { %p186_p11 = scmp.lt.s32.totalorder (!%p160_p10), %s621_s15, 1  ;;  %s468_s5 = sshll.u32 (!%p160_p10), %s621_s15, 5 }
   0xf   : > { %163 = sbr.rel (%p160_p10) target bundleno = 199 (0xc7), region = 32  ;;  %s364_s8 = scalar_lea.hbm (!%p160_p10), %s816_s3, %s468_s5 }
  0x10   : > { %s367_s10 = sshll.u32 (!%p160_p10), %s364_s8, 4  ;;  %s571_s26 = scalar_lea.hbm (!%p160_p10), %s816_s3, 64  ;;  %s368_s10 = int_to_ptr.hbm [resolvable:$true] %s367_s10 }
  0x11   : > { %s565_s18 = sshra.s32 (!%p160_p10), %s368_s10, 4  ;;  %s566_s18 = int_to_ptr.hbm [resolvable:$true] %s565_s18 }
  0x12   : > { %s567_s19 = scalar_lea.hbm (!%p160_p10), %s566_s18, 32  ;;  %p572_p1 = scmp.lt.s32.totalorder (!%p160_p10), %s566_s18, %s816_s3 }
  0x13   : > { %p568_p12 = scmp.ne.s32.totalorder (!%p160_p10), %s566_s18, %s567_s19  ;;  %p573_p2 = scmp.lt.s32.totalorder (!%p160_p10), %s571_s26, %s567_s19 }
  0x14   : > { %v631_v0 = vmov 0   ;;  %v202_v1 = vld [vmem:[%s814_s1 + $0x10] sm:$0xff]  ;;  %v200_v2 = vld [vmem:[%s814_s1] sm:$0xff]  ;;  %s187_s30 = scalar_select %p186_p11, %s621_s15, 1  ;;  %vm224_vm0 = vcmask 130048   ;;  %v195_v6 = vld [vmem:[%s813_s0 + $0x8] sm:$0xff] }
  0x15   : > { %534 = vset.pattern.permute.xlu1 %v631_v0  ;;  %533 = vset.pattern.permute.xlu0 %v631_v0  ;;  %v194_v5 = vld [vmem:[%s813_s0] sm:$0xff]  ;;  %v196_v7 = vld [vmem:[%s813_s0 + $0x10] sm:$0xff]  ;;  %v197_v8 = vld [vmem:[%s813_s0 + $0x18] sm:$0xff]  ;;  %vm346_vm4 = vcmask 523264   ;;  %p569_p13 = pnand %p568_p12, %p694_p4  ;;  %p574_p3 = por %p573_p2, %p572_p1 }
  0x16   : > { %216 = vperm.xlu1 %534, %v202_v1   ;;  %206 = vperm.xlu0 %533, %v200_v2   ;;  %s467_s4 = sshll.u32 %s187_s30, 4  ;;  %v203_v9 = vld [vmem:[%s814_s1 + $0x18] sm:$0xff]  ;;  %v201_v10 = vld [vmem:[%s814_s1 + $0x8] sm:$0xff]  ;;  %s183_s30 = sand.u32 1, %s613_s13  }
  0x17   : > { %s193_s7 = scalar_lea.vmem %s815_s2, %s467_s4  ;;  %s451_s4 = sshll.u32 %s183_s30, 5 }
  0x18   : > { %v199_v3 = vld [vmem:[%s193_s7 + $0x8] sm:$0xff]  ;;  %v198_v4 = vld [vmem:[%s193_s7] sm:$0xff]  ;;  %s185_s6 = scalar_lea.vmem [#allocation2], %s451_s4  ;;  %s352_s11 = scalar_lea.sflag [#allocation3], %s183_s30 }
  0x19   : > { %251 = vmatpush.msra.mxu0 %v199_v3  ;;  %469 = vmatpush.msra.mxu1 %v199_v3  ;;  %s365_s9 = sshll.u32 %s185_s6, 4  ;;  %p570_p0 = pneg %p569_p13  ;;  %s366_s9 = int_to_ptr.vmem [resolvable:$true] %s365_s9 }
  0x1a   : > { %470 = vmatpush.msra.mxu2 %v199_v3  ;;  %471 = vmatpush.msra.mxu3 %v199_v3 }
  0x1b   : > { %252 = vmatpush.msra.mxu0 %v198_v4  ;;  %472 = vmatpush.msra.mxu1 %v198_v4  ;;  %p575_p5 = pnand %p574_p3, %p570_p0 }
  0x1c   : > { %473 = vmatpush.msra.mxu2 %v198_v4  ;;  %474 = vmatpush.msra.mxu3 %v198_v4 }
  0x1d   : > { %454 = vmatmul.msk.f32.vlgmr.msra.gmra.mxu0 %vm224_vm0, %v194_v5  ;;  %455 = vmatmul.msk.f32.vlgmr.msra.gmra.mxu1 %vm224_vm0, %v195_v6 }
  0x1e   : > { %456 = vmatmul.msk.f32.vlgmr.msra.gmra.mxu2 %vm224_vm0, %v196_v7  ;;  %457 = vmatmul.msk.f32.vlgmr.msra.gmra.mxu3 %vm224_vm0, %v197_v8 }
  0x1f   : > { %221 = vperm.xlu1 %534, %v203_v9   ;;  %211 = vperm.xlu0 %533, %v201_v10  }
  0x88   : > { %v207_v11 = vpop.permute.xlu0 %206  ;;  %v217_v12 = vpop.permute.xlu1 %216 }
  0x91   : > { %v212_v13 = vpop.permute.xlu0 %211  ;;  %v222_v20 = vpop.permute.xlu1 %221 }
  0x9a   : > { %v254_v14 = vpop.f32.mrf.mxu0  ;;  %v257_v15 = vpop.f32.mrf.mxu1 }
  0x9b   : > { %v738_v16 = vadd.f32 %v254_v14, %v207_v11  ;;  %v740_v17 = vadd.f32 %v257_v15, %v212_v13 }
  0x9d   : > { %v458_v18 = vmul.f32 -1.442695, %v738_v16  ;;  %v459_v19 = vmul.f32 -1.442695, %v740_v17 }
  0x9f   : > { %535 = vpow2.f32 %v458_v18 }
  0xa0   : > { %537 = vpow2.f32 %v459_v19 }
  0xa1   : > { %v260_v21 = vpop.f32.mrf.mxu2  ;;  %v263_v22 = vpop.f32.mrf.mxu3 }
  0xa2   : > { %v744_v23 = vadd.f32 %v260_v21, %v217_v12  ;;  %v746_v24 = vadd.f32 %v263_v22, %v222_v20 }
  0xa4   : > { %v460_v25 = vmul.f32 -1.442695, %v744_v23  ;;  %v461_v26 = vmul.f32 -1.442695, %v746_v24 }
  0xa5   : > { %v536_v27 = vpop.eup %535 }
  0xa6   : > { %v538_v28 = vpop.eup %537  ;;  %v278_v29 = vadd.f32 1.0, %v536_v27  ;;  %539 = vpow2.f32 %v460_v25 }
  0xa7   : > { %v279_v30 = vadd.f32 1.0, %v538_v28  ;;  %541 = vpow2.f32 %v461_v26 }
  0xa8   : > { %543 = vrcp.f32 %v278_v29  ;;  %v291_v40 = vand.u32 2147483647, %v278_v29  ;;  %v293_v41 = vand.u32 2147483648, %v278_v29  ;;  %vm287_vm3 = vweird.f32 %v278_v29 }
  0xa9   : > { %545 = vrcp.f32 %v279_v30  ;;  %v306_v44 = vand.u32 2147483647, %v279_v30  ;;  %v308_v45 = vand.u32 2147483648, %v279_v30  ;;  %vm302_vm6 = vweird.f32 %v279_v30 }
  0xaa   : > { %v294_v49 = vor.u32 1.1754944e-38, %v293_v41  ;;  %vm292_vm7 = vcmp.eq.f32.partialorder %v291_v40, 8.507059e+37 }
  0xab   : > { %vm307_vm9 = vcmp.eq.f32.partialorder %v306_v44, 8.507059e+37  ;;  %v309_v54 = vor.u32 1.1754944e-38, %v308_v45 }
  0xac   : > { %v540_v31 = vpop.eup %539 }
  0xad   : > { %v542_v32 = vpop.eup %541  ;;  %v750_v33 = vadd.f32 1.0, %v540_v31 }
  0xae   : > { %v544_v34 = vpop.eup %543  ;;  %v752_v35 = vadd.f32 1.0, %v542_v32 }
  0xaf   : > { %v546_v36 = vpop.eup %545  ;;  %v283_v37 = vmul.f32 %v544_v34, %v278_v29  ;;  %547 = vrcp.f32 %v750_v33  ;;  %vm288_vm1 = vweird.f32 %v544_v34  ;;  %v321_v61 = vand.u32 2147483647, %v750_v33 }
  0xb0   : > { %v298_v38 = vmul.f32 %v546_v36, %v279_v30  ;;  %549 = vrcp.f32 %v752_v35  ;;  %vm303_vm2 = vweird.f32 %v546_v36  ;;  %vm289_vm5 = vmor %vm287_vm3, %vm288_vm1  ;;  %v323_v62 = vand.u32 2147483648, %v750_v33 }
  0xb1   : > { %v284_v39 = vsub.f32 1.0, %v283_v37  ;;  %vm304_vm8 = vmor %vm302_vm6, %vm303_vm2  ;;  %vm317_vm11 = vweird.f32 %v750_v33  ;;  %v338_v2 = vand.u32 2147483648, %v752_v35  ;;  %v336_v5 = vand.u32 2147483647, %v752_v35 }
  0xb2   : > { %v299_v42 = vsub.f32 1.0, %v298_v38  ;;  %v324_v6 = vor.u32 1.1754944e-38, %v323_v62  ;;  %vm322_vm14 = vcmp.eq.f32.partialorder %v321_v61, 8.507059e+37  ;;  %vm332_vm15 = vweird.f32 %v752_v35 }
  0xb3   : > { %v285_v43 = vmul.f32 %v544_v34, %v284_v39  ;;  %v339_v10 = vor.u32 1.1754944e-38, %v338_v2  ;;  %vm337_vm1 = vcmp.eq.f32.partialorder %v336_v5, 8.507059e+37 }
  0xb4   : > { %v300_v46 = vmul.f32 %v546_v36, %v299_v42 }
  0xb5   : > { %v548_v47 = vpop.eup %547  ;;  %v286_v48 = vadd.f32 %v544_v34, %v285_v43 }
  0xb6   : > { %v301_v50 = vadd.f32 %v546_v36, %v300_v46  ;;  %v313_v51 = vmul.f32 %v548_v47, %v750_v33  ;;  %v550_v52 = vpop.eup %549  ;;  %vm318_vm10 = vweird.f32 %v548_v47 }
  0xb7   : > { %v290_v53 = vsel %vm289_vm5, %v544_v34, %v286_v48  ;;  %v328_v58 = vmul.f32 %v550_v52, %v752_v35  ;;  %vm333_vm12 = vweird.f32 %v550_v52  ;;  %vm319_vm13 = vmor %vm317_vm11, %vm318_vm10 }
  0xb8   : > { %v295_v55 = vsel %vm292_vm7, %v294_v49, %v290_v53  ;;  %v305_v56 = vsel %vm304_vm8, %v546_v36, %v301_v50  ;;  %v314_v57 = vsub.f32 1.0, %v313_v51  ;;  %vm334_vm0 = vmor %vm332_vm15, %vm333_vm12 }
  0xb9   : > { %v342_v59 = vmul.f32 %v295_v55, %v738_v16  ;;  %v310_v60 = vsel %vm307_vm9, %v309_v54, %v305_v56  ;;  %v329_v1 = vsub.f32 1.0, %v328_v58 }
  0xba   : > { %v343_v63 = vmul.f32 %v310_v60, %v740_v17  ;;  %v315_v0 = vmul.f32 %v548_v47, %v314_v57 }
  0xbb   : > { %347 = vst.msk [vmem:[%s185_s6] sm:$0xff] %vm346_vm4, %v342_v59  ;;  %v330_v4 = vmul.f32 %v550_v52, %v329_v1 }
  0xbc   : > { %348 = vst.msk [vmem:[%s185_s6 + $0x8] sm:$0xff] %vm346_vm4, %v343_v63  ;;  %v316_v3 = vadd.f32 %v548_v47, %v315_v0 }
  0xbd   : > { %v331_v8 = vadd.f32 %v550_v52, %v330_v4 }
  0xbe   : > { %v320_v7 = vsel %vm319_vm13, %v548_v47, %v316_v3 }
  0xbf   : > { %v325_v9 = vsel %vm322_vm14, %v324_v6, %v320_v7  ;;  %v335_v12 = vsel %vm334_vm0, %v550_v52, %v331_v8 }
  0xc0   : > { %v344_v11 = vmul.f32 %v325_v9, %v744_v23  ;;  %v340_v13 = vsel %vm337_vm1, %v339_v10, %v335_v12 }
  0xc1   : > { %v345_v14 = vmul.f32 %v340_v13, %v746_v24 }
  0xc2   : > { %349 = vst.msk [vmem:[%s185_s6 + $0x10] sm:$0xff] %vm346_vm4, %v344_v11 }
  0xc3   : > { %350 = vst.msk [vmem:[%s185_s6 + $0x18] sm:$0xff] %vm346_vm4, %v345_v14 }
  0xc4   : > { %578 = shalt.err (!%p575_p5)
}
  0xc5   : > { %s632_s29 = smov 128   ;;  %s633_s30 = smov 8  }
  0xc6   : > { %475 = dma.vmem_to_hbm [thread:$0]  (%p694_p4), %s366_s9, 512, %s368_s10, %s352_s11, %s632_s29, %s632_s29, %s633_s30  }
  0xc7 PF: > { %p481_p6 = scmp.ge.s32.totalorder %s629_s17, 2  ;;  %s382_s4 = sand.u32 1, %s609_s12  }
  0xc8   : > { %s383_s5 = scalar_lea.sflag [#allocation3], %s382_s4 }
  0xc9   : > { %p478_p7 = pnand %p481_p6, %p701_p8 }
  0xcb   : > { %p479_p9 = pneg %p478_p7 }
  0xcd   : > { %604 = dma.done.wait (%p479_p9), %s383_s5, 512  }
  0xce   : > { %606 = vsyncadd (%p479_p9), %s383_s5, 4294966784  ;;  %s16_s17 = sadd.s32 1, %s629_s17   ;;  %s819_s12 = smov %s613_s13 }
  0xcf   : > { %p13_p10 = scmp.ge.s32.totalorder %s16_s17, 4   ;;  %s820_s13 = smov %s617_s14 }
  0xd0   : > { %s821_s14 = smov %s707_s25  ;;  %s822_s15 = smov %s625_s16 }
  0xd1   : > { %s823_s16 = smov %s825_s20  ;;  %15 = sbr.rel (!%p13_p10) target bundleno = 4 (0x4), region = 67 }
  0xd6   :  { %389 = vsyncpa [#allocation3], 1 }
  0xd7   :  { %391 = vsyncpa [#allocation3 + $0x1], 1 }

</bundles_post_ra>
